<compile_context>
chip_gen: v5e
topology: v5e:2x2
jax: 0.10.0
libtpu: 0.0.40
codegen_flags: <defaults>
</compile_context>

<pallas_src>
import functools

import jax
import jax.numpy as jnp
from jax import lax
from jax.experimental import pallas as pl
from jax.experimental.pallas import tpu as pltpu


def _round_up(x, m):
    return (x + m - 1) // m * m


def _mmd_tile_kernel(scale_ref, row_ref, col_ref, row_meta_ref, col_meta_ref,
                     out_ref, acc_ref, *, kernel_mul, kernel_num):
    """One (tile, tile) tile of the pairwise RBF-kernel matrix.

    scale_ref    : SMEM (1,)   f32, -1/bandwidth
    row_ref      : (tm, Dp)    gram dtype, resident across j
    col_ref      : (tn, Dp)    gram dtype, streamed per j
    row_meta_ref : (tm, 2)     f32, [:,0]=||x||^2, [:,1]=sign (+1 src/-1 tgt/0 pad)
    col_meta_ref : (2, tn)     f32, [0,:]=||x||^2, [1,:]=sign
    out_ref      : (1, 8, 128) f32, per-row-tile scalar partial (broadcast)
    acc_ref      : (tm, tn)    f32 scratch, col-signed kernel accumulator
    """
    i = pl.program_id(0)               # row tile ("parallel")
    j = pl.program_id(1)               # col tile (reduction, "arbitrary")

    # Init must stay OUTSIDE the symmetry guard: row tile i's first surviving
    # column tile is j == i, not j == 0.
    @pl.when(j == 0)
    def _init():
        acc_ref[...] = jnp.zeros_like(acc_ref)
        out_ref[...] = jnp.zeros_like(out_ref)

    # Kernel matrix is symmetric: skip strict lower-triangle tiles; weight the
    # strict upper triangle by 2 (the sign-weighted sum is unchanged).
    @pl.when(j >= i)
    def _compute():
        # Gram block on the MXU; contraction on the lane axis of BOTH operands
        # so no transpose is materialized.  bf16 x bf16 -> f32 accumulate.
        gram = lax.dot_general(
            row_ref[...], col_ref[...],
            dimension_numbers=(((1,), (1,)), ((), ())),
            preferred_element_type=jnp.float32)                  # (tm, tn)

        sq_row = row_meta_ref[:, 0:1]                            # (tm, 1) f32
        sq_col = col_meta_ref[0:1, :]                            # (1, tn) f32
        # Clamp tiny negatives from the Gram-identity rounding.
        l2 = jnp.maximum(sq_row + sq_col - 2.0 * gram, 0.0)      # (tm, tn)

        # Hoisted bandwidth division: one multiply by -1/bandwidth, then only
        # compile-time scalar multiplies + exp (EUP) per bandwidth.
        t = l2 * scale_ref[0]
        kern = jnp.exp(t)
        for k in range(1, kernel_num):
            kern = kern + jnp.exp(t * (kernel_mul ** (-k)))

        col_sign = col_meta_ref[1:2, :]                          # (1, tn)
        weight = jnp.where(j == i, 1.0, 2.0)                     # diag vs off-diag
        # Pure VPU accumulate; the cross-lane reduction is deferred.
        acc_ref[...] += (weight * col_sign) * kern

    # Finalize once per row tile (j == gj-1 always satisfies j >= i).
    @pl.when(j == pl.num_programs(1) - 1)
    def _finalize():
        row_sign = row_meta_ref[:, 1:2]                          # (tm, 1)
        out_ref[...] += jnp.sum(acc_ref[...] * row_sign)


def mmd_loss(source, target, *, kernel_mul=2.0, kernel_num=5, fix_sigma=None,
             block=512, gram_dtype=jnp.bfloat16):
    """RBF-kernel MMD loss matching DeepDA's MMDLoss.forward (kernel_type='rbf').

    source, target: (B, D).  Returns shape (1,) f32 (torch returns a 1-element
    tensor).  gram_dtype controls the MXU input precision for the Gram block:
    bf16 (default) = native MXU rate + half the streamed HBM traffic;
    jnp.float32 for bit-level-tighter results.
    """
    assert source.shape == target.shape, "source/target must share shape"
    B, D = source.shape
    n = 2 * B

    s32 = source.astype(jnp.float32)
    t32 = target.astype(jnp.float32)
    total = jnp.concatenate([s32, t32], axis=0)                      # (n, D)
    # TODO(synk): the concat+pad costs one extra HBM round trip of the (2B, D)
    # inputs; removable with a stacked (2, Bp, Dp) layout + squeezed leading
    # block dim at the price of a messier sign/tile derivation.

    # Center the data: pairwise L2 distances are translation invariant, and
    # centering (a) makes the closed-form bandwidth cancellation-free and
    # (b) keeps ||x||^2 small so the bf16 Gram error stays tiny.
    mean = jnp.mean(total, axis=0, keepdims=True)
    centered = total - mean                                          # (n, D) f32
    sq = jnp.sum(centered * centered, axis=1)                        # (n,)   f32

    if fix_sigma is not None:
        bandwidth = jnp.asarray(fix_sigma, jnp.float32)
    else:
        # sum_ij ||x_i - x_j||^2 == 2 n sum_i ||x_i - mean||^2  (exact).
        sum_l2 = 2.0 * float(n) * jnp.sum(sq)
        bandwidth = sum_l2 / float(n * n - n)
    bandwidth = bandwidth / (kernel_mul ** (kernel_num // 2))
    # bandwidth == 0 (all rows identical) yields NaN kernel entries and then a
    # zero loss below, matching torch's isnan early-out.
    neg_inv_bw = jnp.reshape(-1.0 / bandwidth, (1,)).astype(jnp.float32)

    # ---- generation-aware sizing -------------------------------------------
    try:
        vmem_cap = int(pltpu.get_tpu_info().vmem_capacity_bytes)
    except Exception:                     # conservative fallback
        vmem_cap = 128 * 1024 * 1024
    vmem_limit = max(32 * 1024 * 1024, int(vmem_cap * 0.85))
    two_cores = vmem_cap <= 64 * 1024 * 1024       # v7x: 64 MiB VMEM per TC

    Dp = _round_up(D, 128)                          # lane-pad features
    np_min = _round_up(n, 128)
    dsize = jnp.dtype(gram_dtype).itemsize

    tile = max(128, _round_up(int(block), 128))     # MXU-friendly, mult. of 128
    tile = min(tile, np_min)

    def _vmem_est(t_):
        # 2 data inputs x 2 pipeline buffers + (t,t) scratch + ~6 f32 tile
        # intermediates + slack for metas / outputs / compiler scratch.
        return 4 * t_ * Dp * dsize + 28 * t_ * t_ + (4 << 20)

    while tile > 128 and _vmem_est(tile) > vmem_limit:
        tile -= 128

    # v7x: both TensorCores only help if the "parallel" row axis has >= 2 tiles.
    if two_cores and np_min >= 256 and np_min // tile < 2:
        tile = max(128, (np_min // 2) // 128 * 128)

    Np = _round_up(n, tile)
    gi = gj = Np // tile

    # ---- operands -----------------------------------------------------------
    data = jnp.pad(centered, ((0, Np - n), (0, Dp - D))).astype(gram_dtype)

    sign = jnp.concatenate([jnp.ones((B,), jnp.float32),
                            -jnp.ones((B,), jnp.float32),
                            jnp.zeros((Np - n,), jnp.float32)])
    sq_pad = jnp.pad(sq, (0, Np - n))
    row_meta = jnp.stack([sq_pad, sign], axis=1)    # (Np, 2)
    col_meta = jnp.stack([sq_pad, sign], axis=0)    # (2, Np)

    kern_fn = functools.partial(_mmd_tile_kernel,
                                kernel_mul=float(kernel_mul),
                                kernel_num=int(kernel_num))

    out = pl.pallas_call(
        kern_fn,
        out_shape=jax.ShapeDtypeStruct((gi, 8, 128), jnp.float32),
        grid=(gi, gj),
        in_specs=[
            pl.BlockSpec(memory_space=pltpu.MemorySpace.SMEM),      # -1/bandwidth
            pl.BlockSpec((tile, Dp), lambda i, j: (i, 0)),          # row tile (resident)
            pl.BlockSpec((tile, Dp), lambda i, j: (j, 0)),          # col tile (streamed)
            pl.BlockSpec((tile, 2), lambda i, j: (i, 0)),           # row ||x||^2 / sign
            pl.BlockSpec((2, tile), lambda i, j: (0, j)),           # col ||x||^2 / sign
        ],
        out_specs=pl.BlockSpec((1, 8, 128), lambda i, j: (i, 0, 0)),
        scratch_shapes=[pltpu.VMEM((tile, tile), jnp.float32)],
        compiler_params=pltpu.CompilerParams(
            dimension_semantics=("parallel", "arbitrary"),
            vmem_limit_bytes=vmem_limit),
    )(neg_inv_bw, data, data, row_meta, col_meta)

    partials = out[:, 0, 0]                          # (gi,)
    loss = jnp.sum(partials) / float(B * B)
    # torch: if torch.sum(torch.isnan(sum(kernels))): return 0
    loss = jnp.where(jnp.isnan(loss), 0.0, loss)
    return loss.reshape(1)


def _mmd_loss_ref(source, target, kernel_mul=2.0, kernel_num=5):
    """Pure-JAX reference mirroring the torch code, for sanity checks."""
    B = source.shape[0]
    total = jnp.concatenate([source, target], axis=0).astype(jnp.float32)
    n = total.shape[0]
    diff = total[None, :, :] - total[:, None, :]
    l2 = jnp.sum(diff * diff, axis=2)
    bandwidth = jnp.sum(l2) / (n * n - n)
    bandwidth = bandwidth / (kernel_mul ** (kernel_num // 2))
    kernels = sum(jnp.exp(-l2 / (bandwidth * kernel_mul ** i))
                  for i in range(kernel_num))
    SS = kernels[:B, :B]
    TT = kernels[B:, B:]
    ST = kernels[:B, B:]
    return jnp.sum((SS + TT - 2.0 * ST) / B / B).reshape(1)


if __name__ == "__main__":
    key = jax.random.PRNGKey(0)
    k1, k2, k3, k4 = jax.random.split(key, 4)

    # Small config: single-tile grid, f32 Gram, tight tolerance.
    B, D = 4, 32
    src = jax.random.normal(k1, (B, D), dtype=jnp.float32)
    tgt = jax.random.normal(k2, (B, D), dtype=jnp.float32) + 0.5
    loss = mmd_loss(src, tgt, gram_dtype=jnp.float32)
    jax.block_until_ready(loss)
    ref = _mmd_loss_ref(src, tgt)
    assert jnp.allclose(loss, ref, rtol=2e-4, atol=1e-5), (loss, ref)

    # Multi-tile config (3x3 tile grid, symmetry skip, 4 padded rows), f32 Gram.
    B2, D2 = 190, 96
    src2 = jax.random.normal(k3, (B2, D2), dtype=jnp.float32)
    tgt2 = jax.random.normal(k4, (B2, D2), dtype=jnp.float32) + 0.5
    loss2 = mmd_loss(src2, tgt2, block=128, gram_dtype=jnp.float32)
    jax.block_until_ready(loss2)
    ref2 = _mmd_loss_ref(src2, tgt2)
    assert jnp.allclose(loss2, ref2, rtol=2e-4, atol=1e-5), (loss2, ref2)

    # Same config on the fast path (bf16 Gram on centered data); looser tol.
    loss3 = mmd_loss(src2, tgt2, block=128)          # default gram_dtype=bf16
    jax.block_until_ready(loss3)
    assert jnp.allclose(loss3, ref2, rtol=2e-2, atol=2e-3), (loss3, ref2)

    print("KERNEL_OK")
</pallas_src>

<mosaic_0001>
module attributes {stable_mosaic.version = 11 : i64} {
  func.func @_mmd_tile_kernel(%arg0: i32, %arg1: i32, %arg2: memref<1xf32, #tpu.memory_space<smem>>, %arg3: memref<128x128xf32, #tpu.memory_space<vmem>>, %arg4: memref<128x128xf32, #tpu.memory_space<vmem>>, %arg5: memref<128x2xf32, #tpu.memory_space<vmem>>, %arg6: memref<2x128xf32, #tpu.memory_space<vmem>>, %arg7: memref<1x8x128xf32, #tpu.memory_space<vmem>>, %arg8: memref<128x128xf32, #tpu.memory_space<vmem>>) attributes {dimension_semantics = [#tpu.dimension_semantics<parallel>, #tpu.dimension_semantics<arbitrary>], iteration_bounds = array<i64: 1, 1>, scalar_prefetch = 0 : i64, scratch_operands = 1 : i64, tpu.core_type = #tpu.core_type<tc>, window_params = [{transform_indices = @transform_0, window_bounds = array<i64: 1>}, {transform_indices = @transform_1, window_bounds = array<i64: 128, 128>}, {transform_indices = @transform_2, window_bounds = array<i64: 128, 128>}, {transform_indices = @transform_3, window_bounds = array<i64: 128, 2>}, {transform_indices = @transform_4, window_bounds = array<i64: 2, 128>}, {transform_indices = @transform_5, window_bounds = array<i64: 1, 8, 128>}]} {
    %c0_i32 = arith.constant 0 : i32
    %0 = arith.cmpi eq, %arg1, %c0_i32 : i32
    %1 = arith.extui %0 : i1 to i32
    %c0_i32_0 = arith.constant 0 : i32
    %2 = arith.cmpi ne, %1, %c0_i32_0 : i32
    scf.if %2 {
      %cst = arith.constant 0.000000e+00 : f32
      %9 = vector.broadcast %cst : f32 to vector<128x128xf32>
      %c0 = arith.constant 0 : index
      %c0_4 = arith.constant 0 : index
      %10 = vector.load %arg8[%c0, %c0_4] : memref<128x128xf32, #tpu.memory_space<vmem>>, vector<128x128xf32>
      tpu.vector_store %arg8[%c0, %c0_4], %9 {strides = array<i32>} : memref<128x128xf32, #tpu.memory_space<vmem>>, vector<128x128xf32>,
      %cst_5 = arith.constant 0.000000e+00 : f32
      %11 = vector.broadcast %cst_5 : f32 to vector<1x8x128xf32>
      %c0_6 = arith.constant 0 : index
      %c0_7 = arith.constant 0 : index
      %c0_8 = arith.constant 0 : index
      %12 = vector.load %arg7[%c0_6, %c0_7, %c0_8] : memref<1x8x128xf32, #tpu.memory_space<vmem>>, vector<1x8x128xf32>
      tpu.vector_store %arg7[%c0_6, %c0_7, %c0_8], %11 {strides = array<i32>} : memref<1x8x128xf32, #tpu.memory_space<vmem>>, vector<1x8x128xf32>,
    } else {
    }
    %3 = arith.cmpi sge, %arg1, %arg0 : i32
    %4 = arith.extui %3 : i1 to i32
    %c0_i32_1 = arith.constant 0 : i32
    %5 = arith.cmpi ne, %4, %c0_i32_1 : i32
    scf.if %5 {
      %c0 = arith.constant 0 : index
      %c0_4 = arith.constant 0 : index
      %9 = vector.load %arg3[%c0, %c0_4] : memref<128x128xf32, #tpu.memory_space<vmem>>, vector<128x128xf32>
      %c0_5 = arith.constant 0 : index
      %c0_6 = arith.constant 0 : index
      %10 = vector.load %arg4[%c0_5, %c0_6] : memref<128x128xf32, #tpu.memory_space<vmem>>, vector<128x128xf32>
      %cst = arith.constant dense<0.000000e+00> : vector<128x128xf32>
      %11 = tpu.matmul %9, %10, %cst {dimension_numbers = #tpu.dot_dimension_numbers<[1], [1], [0], [0], [0, 0, 1, 0], [], []>} : vector<128x128xf32>, vector<128x128xf32>, vector<128x128xf32> -> vector<128x128xf32>
      %c0_7 = arith.constant 0 : index
      %c0_8 = arith.constant 0 : index
      %12 = vector.load %arg5[%c0_7, %c0_8] : memref<128x2xf32, #tpu.memory_space<vmem>>, vector<128x1xf32>
      %c0_9 = arith.constant 0 : index
      %c0_10 = arith.constant 0 : index
      %13 = vector.load %arg6[%c0_9, %c0_10] : memref<2x128xf32, #tpu.memory_space<vmem>>, vector<1x128xf32>
      %14 = vector.broadcast %12 : vector<128x1xf32> to vector<128x128xf32>
      %15 = vector.broadcast %13 : vector<1x128xf32> to vector<128x128xf32>
      %16 = arith.addf %14, %15 : vector<128x128xf32>
      %cst_11 = arith.constant 2.000000e+00 : f32
      %17 = vector.broadcast %cst_11 : f32 to vector<128x128xf32>
      %18 = arith.mulf %17, %11 : vector<128x128xf32>
      %19 = arith.subf %16, %18 : vector<128x128xf32>
      %cst_12 = arith.constant 0.000000e+00 : f32
      %20 = vector.broadcast %cst_12 : f32 to vector<128x128xf32>
      %21 = arith.maximumf %19, %20 : vector<128x128xf32>
      %c0_13 = arith.constant 0 : index
      %22 = memref.load %arg2[%c0_13] : memref<1xf32, #tpu.memory_space<smem>>
      %23 = vector.broadcast %22 : f32 to vector<128x128xf32>
      %24 = arith.mulf %21, %23 : vector<128x128xf32>
      %25 = math.exp %24 : vector<128x128xf32>
      %cst_14 = arith.constant 5.000000e-01 : f32
      %26 = vector.broadcast %cst_14 : f32 to vector<128x128xf32>
      %27 = arith.mulf %24, %26 : vector<128x128xf32>
      %28 = math.exp %27 : vector<128x128xf32>
      %29 = arith.addf %25, %28 : vector<128x128xf32>
      %cst_15 = arith.constant 2.500000e-01 : f32
      %30 = vector.broadcast %cst_15 : f32 to vector<128x128xf32>
      %31 = arith.mulf %24, %30 : vector<128x128xf32>
      %32 = math.exp %31 : vector<128x128xf32>
      %33 = arith.addf %29, %32 : vector<128x128xf32>
      %cst_16 = arith.constant 1.250000e-01 : f32
      %34 = vector.broadcast %cst_16 : f32 to vector<128x128xf32>
      %35 = arith.mulf %24, %34 : vector<128x128xf32>
      %36 = math.exp %35 : vector<128x128xf32>
      %37 = arith.addf %33, %36 : vector<128x128xf32>
      %cst_17 = arith.constant 6.250000e-02 : f32
      %38 = vector.broadcast %cst_17 : f32 to vector<128x128xf32>
      %39 = arith.mulf %24, %38 : vector<128x128xf32>
      %40 = math.exp %39 : vector<128x128xf32>
      %41 = arith.addf %37, %40 : vector<128x128xf32>
      %c1 = arith.constant 1 : index
      %c0_18 = arith.constant 0 : index
      %42 = vector.load %arg6[%c1, %c0_18] : memref<2x128xf32, #tpu.memory_space<vmem>>, vector<1x128xf32>
      %43 = arith.cmpi eq, %arg1, %arg0 : i32
      %cst_19 = arith.constant 1.000000e+00 : f32
      %cst_20 = arith.constant 2.000000e+00 : f32
      %44 = arith.select %43, %cst_19, %cst_20 : f32
      %c0_21 = arith.constant 0 : index
      %c0_22 = arith.constant 0 : index
      %45 = vector.load %arg8[%c0_21, %c0_22] : memref<128x128xf32, #tpu.memory_space<vmem>>, vector<128x128xf32>
      %46 = vector.broadcast %44 : f32 to vector<1x128xf32>
      %47 = arith.mulf %46, %42 : vector<1x128xf32>
      %48 = vector.broadcast %47 : vector<1x128xf32> to vector<128x128xf32>
      %49 = arith.mulf %48, %41 : vector<128x128xf32>
      %50 = arith.addf %45, %49 : vector<128x128xf32>
      %c0_23 = arith.constant 0 : index
      %c0_24 = arith.constant 0 : index
      %51 = vector.load %arg8[%c0_23, %c0_24] : memref<128x128xf32, #tpu.memory_space<vmem>>, vector<128x128xf32>
      tpu.vector_store %arg8[%c0_23, %c0_24], %50 {strides = array<i32>} : memref<128x128xf32, #tpu.memory_space<vmem>>, vector<128x128xf32>,
    } else {
    }
    %c0_i32_2 = arith.constant 0 : i32
    %6 = arith.cmpi eq, %arg1, %c0_i32_2 : i32
    %7 = arith.extui %6 : i1 to i32
    %c0_i32_3 = arith.constant 0 : i32
    %8 = arith.cmpi ne, %7, %c0_i32_3 : i32
    scf.if %8 {
      %c0 = arith.constant 0 : index
      %c1 = arith.constant 1 : index
      %9 = vector.load %arg5[%c0, %c1] : memref<128x2xf32, #tpu.memory_space<vmem>>, vector<128x1xf32>
      %c0_4 = arith.constant 0 : index
      %c0_5 = arith.constant 0 : index
      %c0_6 = arith.constant 0 : index
      %10 = vector.load %arg7[%c0_4, %c0_5, %c0_6] : memref<1x8x128xf32, #tpu.memory_space<vmem>>, vector<1x8x128xf32>
      %c0_7 = arith.constant 0 : index
      %c0_8 = arith.constant 0 : index
      %11 = vector.load %arg8[%c0_7, %c0_8] : memref<128x128xf32, #tpu.memory_space<vmem>>, vector<128x128xf32>
      %12 = vector.broadcast %9 : vector<128x1xf32> to vector<128x128xf32>
      %13 = arith.mulf %11, %12 : vector<128x128xf32>
      %14 = vector.shape_cast %13 : vector<128x128xf32> to vector<1x128x128xf32>
      %cst = arith.constant dense<0.000000e+00> : vector<1xf32>
      %15 = vector.multi_reduction <add>, %14, %cst [1, 2] : vector<1x128x128xf32> to vector<1xf32>
      %16 = vector.shape_cast %15 : vector<1xf32> to vector<1x1x1xf32>
      %17 = vector.extract %16[0, 0, 0] : f32 from vector<1x1x1xf32>
      %18 = vector.broadcast %17 : f32 to vector<1x8x128xf32>
      %19 = arith.addf %10, %18 : vector<1x8x128xf32>
      %c0_9 = arith.constant 0 : index
      %c0_10 = arith.constant 0 : index
      %c0_11 = arith.constant 0 : index
      %20 = vector.load %arg7[%c0_9, %c0_10, %c0_11] : memref<1x8x128xf32, #tpu.memory_space<vmem>>, vector<1x8x128xf32>
      tpu.vector_store %arg7[%c0_9, %c0_10, %c0_11], %19 {strides = array<i32>} : memref<1x8x128xf32, #tpu.memory_space<vmem>>, vector<1x8x128xf32>,
    } else {
    }
    return
  }
  func.func @transform_0(%arg0: i32, %arg1: i32) -> i32 {
    %c0_i32 = arith.constant 0 : i32
    %c0_i32_0 = arith.constant 0 : i32
    return %c0_i32 : i32
  }
  func.func @transform_1(%arg0: i32, %arg1: i32) -> (i32, i32) {
    %c0_i32 = arith.constant 0 : i32
    %c0_i32_0 = arith.constant 0 : i32
    return %arg0, %c0_i32 : i32, i32
  }
  func.func @transform_2(%arg0: i32, %arg1: i32) -> (i32, i32) {
    %c0_i32 = arith.constant 0 : i32
    %c0_i32_0 = arith.constant 0 : i32
    return %arg1, %c0_i32 : i32, i32
  }
  func.func @transform_3(%arg0: i32, %arg1: i32) -> (i32, i32) {
    %c0_i32 = arith.constant 0 : i32
    %c0_i32_0 = arith.constant 0 : i32
    return %arg0, %c0_i32 : i32, i32
  }
  func.func @transform_4(%arg0: i32, %arg1: i32) -> (i32, i32) {
    %c0_i32 = arith.constant 0 : i32
    %c0_i32_0 = arith.constant 0 : i32
    return %c0_i32, %arg1 : i32, i32
  }
  func.func @transform_5(%arg0: i32, %arg1: i32) -> (i32, i32, i32) {
    %c0_i32 = arith.constant 0 : i32
    %c0_i32_0 = arith.constant 0 : i32
    %c0_i32_1 = arith.constant 0 : i32
    return %arg0, %c0_i32, %c0_i32_0 : i32, i32, i32
  }
}

</mosaic_0001>

<bundles_post_ra>
// kernel: tpu_custom_call.1
= control target key start
LH: loop header
LB: loop body
LE: loop exit
PB: predicated region body
PF: predicated region fallthrough
CT: control target
= control target key end

     0   :  { %11 = vsyncpa [#allocation5], 0  ;;  %s1607_s0 = inlined_call_operand.<no memory space> [shape: f32[1], index: 0, kind: input, shape index: {}]   ;;  %s1608_s1 = inlined_call_operand.vmem [shape: f32[128,128], index: 1, kind: input, shape index: {}]   ;;  %s1609_s2 = inlined_call_operand.hbm [shape: f32[128,128], index: 2, kind: input, shape index: {}]   ;;  %s1610_s3 = inlined_call_operand.vmem [shape: f32[128,2], index: 3, kind: input, shape index: {}]   ;;  %s1611_s4 = inlined_call_operand.vmem [shape: f32[2,128], index: 4, kind: input, shape index: {}]   ;;  %s1612_s5 = inlined_call_operand.hbm [shape: f32[1,8,128], index: 5, kind: output, shape index: {}]  }
   0x1   :  { %12 = vsyncpa [#allocation6], 0  ;;  %s21_s20 = sshll.u32 %s1609_s2, 4  ;;  %s1151_s21 = smov [#allocation4]   ;;  %s22_s20 = int_to_ptr.hbm [resolvable:$true] %s21_s20 }
   0x2   :  { %s23_s22 = sshll.u32 %s1151_s21, 4  ;;  %s1152_s23 = smov 128   ;;  %s24_s22 = int_to_ptr.vmem [resolvable:$true] %s23_s22 }
   0x3   :  { %s1153_s24 = smov 8  }
   0x4   :  { %29 = dma.hbm_to_vmem [thread:$0]  %s22_s20, 2048, %s24_s22, [#allocation5], %s1152_s23, %s1152_s23, %s1153_s24  }
   0x5   :  { %1147 = dma.done.wait [#allocation5], 2048  }
   0x6   :  { %1148 = vsyncadd [#allocation5], 4294965248  ;;  %v1154_v0 = vmov 0   ;;  %v94_v1 = vld [vmem:[#allocation4 + $0x78] sm:$0xff]  ;;  %v93_v2 = vld [vmem:[#allocation4 + $0x70] sm:$0xff]  ;;  %v1155_v27 = vmov 1  }
   0x7   :  { %932 = vset.pattern.permute.xlu1 %v1154_v0  ;;  %931 = vset.pattern.permute.xlu0 %v1154_v0  ;;  %v1193_v3 = vld [vmem:[%s1610_s3 + $0x10] sm:$0xff]  ;;  %v1199_v4 = vld [vmem:[%s1610_s3] sm:$0xff]  ;;  %v92_v5 = vld [vmem:[#allocation4 + $0x68] sm:$0xff]  ;;  %s864_s16 = sshll.u32 %s1612_s5, 4  ;;  %s865_s16 = int_to_ptr.hbm [resolvable:$true] %s864_s16 }
   0x8   :  { %933 = vset.pattern.permute.xlu2 %v1154_v0  ;;  %95 = vmatpush.xpose.msra.mxu0 %v94_v1  ;;  %v1205_v6 = vld [vmem:[%s1610_s3 + $0x18] sm:$0xff]  ;;  %v91_v7 = vld [vmem:[#allocation4 + $0x60] sm:$0xff]  ;;  %v1210_v8 = vld [vmem:[%s1610_s3 + $0x8] sm:$0xff] }
   0x9   :  { %874 = vmatpush.xpose.msra.mxu1 %v94_v1  ;;  %875 = vmatpush.xpose.msra.mxu2 %v94_v1  ;;  %v90_v9 = vld [vmem:[#allocation4 + $0x58] sm:$0xff]  ;;  %v89_v11 = vld [vmem:[#allocation4 + $0x50] sm:$0xff]  ;;  %v88_v13 = vld [vmem:[#allocation4 + $0x48] sm:$0xff] }
   0xa   :  { %876 = vmatpush.xpose.msra.mxu3 %v94_v1  ;;  %189 = vperm.xlu1 %932, %v1193_v3   ;;  %v1217_v10 = vld [vmem:[%s1610_s3 + $0x38] sm:$0xff]  ;;  %v1222_v12 = vld [vmem:[%s1610_s3 + $0x30] sm:$0xff]  ;;  %v1229_v14 = vld [vmem:[%s1610_s3 + $0x20] sm:$0xff] }
   0xb   :  { %179 = vperm.xlu0 %931, %v1199_v4   ;;  %199 = vperm.xlu2 %933, %v1229_v14   ;;  %v1235_v15 = vld [vmem:[%s1610_s3 + $0x50] sm:$0xff]  ;;  %v87_v16 = vld [vmem:[#allocation4 + $0x40] sm:$0xff]  ;;  %v1240_v17 = vld [vmem:[%s1610_s3 + $0x48] sm:$0xff] }
   0xc   :  { %96 = vmatpush.xpose.msra.mxu0 %v93_v2  ;;  %v86_v18 = vld [vmem:[#allocation4 + $0x38] sm:$0xff]  ;;  %v165_v19 = vld [vmem:[%s1610_s3 + $0x28] sm:$0xff]  ;;  %v1255_v21 = vld [vmem:[%s1610_s3 + $0x60] sm:$0xff] }
   0xd   :  { %877 = vmatpush.xpose.msra.mxu1 %v93_v2  ;;  %878 = vmatpush.xpose.msra.mxu2 %v93_v2  ;;  %v1250_v20 = vld [vmem:[%s1610_s3 + $0x68] sm:$0xff]  ;;  %v85_v22 = vld [vmem:[#allocation4 + $0x30] sm:$0xff]  ;;  %v168_v23 = vld [vmem:[%s1610_s3 + $0x40] sm:$0xff] }
   0xe   :  { %879 = vmatpush.xpose.msra.mxu3 %v93_v2  ;;  %v84_v24 = vld [vmem:[#allocation4 + $0x28] sm:$0xff]  ;;  %v1265_v25 = vld [vmem:[%s1610_s3 + $0x78] sm:$0xff]  ;;  %v83_v26 = vld [vmem:[#allocation4 + $0x20] sm:$0xff] }
   0xf   :  { %v171_v28 = vld [vmem:[%s1610_s3 + $0x58] sm:$0xff]  ;;  %v81_v30 = vld [vmem:[#allocation4 + $0x10] sm:$0xff]  ;;  %v80_v32 = vld [vmem:[#allocation4 + $0x8] sm:$0xff] }
  0x10   :  { %97 = vmatpush.xpose.msra.mxu0 %v92_v5  ;;  %v82_v29 = vld [vmem:[#allocation4 + $0x18] sm:$0xff]  ;;  %v174_v31 = vld [vmem:[%s1610_s3 + $0x70] sm:$0xff]  ;;  %v79_v33 = vld [vmem:[#allocation4] sm:$0xff] }
  0x11   :  { %880 = vmatpush.xpose.msra.mxu1 %v92_v5  ;;  %881 = vmatpush.xpose.msra.mxu2 %v92_v5  ;;  %v63_v34 = vld [vmem:[%s1608_s1] sm:$0xff]  ;;  %v64_v38 = vld [vmem:[%s1608_s1 + $0x8] sm:$0xff]  ;;  %v65_v42 = vld [vmem:[%s1608_s1 + $0x10] sm:$0xff] }
  0x12   :  { %882 = vmatpush.xpose.msra.mxu3 %v92_v5  ;;  %194 = vperm.xlu1 %932, %v1205_v6   ;;  %v67_v35 = vld [vmem:[%s1608_s1 + $0x20] sm:$0xff]  ;;  %v68_v39 = vld [vmem:[%s1608_s1 + $0x28] sm:$0xff]  ;;  %v69_v43 = vld [vmem:[%s1608_s1 + $0x30] sm:$0xff]  ;;  %v1344_v5 = vstv %s1607_s0 }
  0x13   :  { %184 = vperm.xlu0 %931, %v1210_v8   ;;  %204 = vperm.xlu2 %933, %v165_v19   ;;  %v71_v36 = vld [vmem:[%s1608_s1 + $0x40] sm:$0xff]  ;;  %v72_v40 = vld [vmem:[%s1608_s1 + $0x48] sm:$0xff]  ;;  %v73_v44 = vld [vmem:[%s1608_s1 + $0x50] sm:$0xff] }
  0x14   :  { %98 = vmatpush.xpose.msra.mxu0 %v91_v7  ;;  %v75_v37 = vld [vmem:[%s1608_s1 + $0x60] sm:$0xff]  ;;  %v76_v41 = vld [vmem:[%s1608_s1 + $0x68] sm:$0xff]  ;;  %v77_v45 = vld [vmem:[%s1608_s1 + $0x70] sm:$0xff] }
  0x15   :  { %883 = vmatpush.xpose.msra.mxu1 %v91_v7  ;;  %884 = vmatpush.xpose.msra.mxu2 %v91_v7  ;;  %v66_v46 = vld [vmem:[%s1608_s1 + $0x18] sm:$0xff]  ;;  %v1337_v57 = vld [vmem:[%s1611_s4] ss:$0 sm:$0xff] }
  0x16   :  { %885 = vmatpush.xpose.msra.mxu3 %v91_v7  ;;  %v70_v47 = vld [vmem:[%s1608_s1 + $0x38] sm:$0xff] }
  0x17   :  { %v74_v48 = vld [vmem:[%s1608_s1 + $0x58] sm:$0xff] }
  0x18   :  { %99 = vmatpush.xpose.msra.mxu0 %v90_v9  ;;  %v78_v49 = vld [vmem:[%s1608_s1 + $0x78] sm:$0xff] }
  0x19   :  { %886 = vmatpush.xpose.msra.mxu1 %v90_v9  ;;  %887 = vmatpush.xpose.msra.mxu2 %v90_v9 }
  0x1a   :  { %888 = vmatpush.xpose.msra.mxu3 %v90_v9  ;;  %214 = vperm.xlu1 %932, %v1217_v10  }
  0x1b   :  { %209 = vperm.xlu0 %931, %v1222_v12   ;;  %219 = vperm.xlu2 %933, %v168_v23  }
  0x1c   :  { %100 = vmatpush.xpose.msra.mxu0 %v89_v11 }
  0x1d   :  { %889 = vmatpush.xpose.msra.mxu1 %v89_v11  ;;  %890 = vmatpush.xpose.msra.mxu2 %v89_v11 }
  0x1e   :  { %891 = vmatpush.xpose.msra.mxu3 %v89_v11 }
  0x20   :  { %101 = vmatpush.xpose.msra.mxu0 %v88_v13 }
  0x21   :  { %892 = vmatpush.xpose.msra.mxu1 %v88_v13  ;;  %893 = vmatpush.xpose.msra.mxu2 %v88_v13 }
  0x22   :  { %894 = vmatpush.xpose.msra.mxu3 %v88_v13  ;;  %229 = vperm.xlu1 %932, %v1235_v15  }
  0x23   :  { %224 = vperm.xlu0 %931, %v1240_v17   ;;  %234 = vperm.xlu2 %933, %v171_v28  }
  0x24   :  { %102 = vmatpush.xpose.msra.mxu0 %v87_v16 }
  0x25   :  { %895 = vmatpush.xpose.msra.mxu1 %v87_v16  ;;  %896 = vmatpush.xpose.msra.mxu2 %v87_v16 }
  0x26   :  { %897 = vmatpush.xpose.msra.mxu3 %v87_v16 }
  0x28   :  { %103 = vmatpush.xpose.msra.mxu0 %v86_v18 }
  0x29   :  { %898 = vmatpush.xpose.msra.mxu1 %v86_v18  ;;  %899 = vmatpush.xpose.msra.mxu2 %v86_v18 }
  0x2a   :  { %900 = vmatpush.xpose.msra.mxu3 %v86_v18  ;;  %244 = vperm.xlu1 %932, %v1250_v20  }
  0x2b   :  { %239 = vperm.xlu0 %931, %v1255_v21   ;;  %249 = vperm.xlu2 %933, %v174_v31  }
  0x2c   :  { %104 = vmatpush.xpose.msra.mxu0 %v85_v22 }
  0x2d   :  { %901 = vmatpush.xpose.msra.mxu1 %v85_v22  ;;  %902 = vmatpush.xpose.msra.mxu2 %v85_v22 }
  0x2e   :  { %903 = vmatpush.xpose.msra.mxu3 %v85_v22 }
  0x30   :  { %105 = vmatpush.xpose.msra.mxu0 %v84_v24 }
  0x31   :  { %904 = vmatpush.xpose.msra.mxu1 %v84_v24  ;;  %905 = vmatpush.xpose.msra.mxu2 %v84_v24 }
  0x32   :  { %906 = vmatpush.xpose.msra.mxu3 %v84_v24  ;;  %934 = vset.pattern.permute.xlu1 %v1155_v27 }
  0x33   :  { %736 = vperm.xlu1 %934, %v1199_v4   ;;  %254 = vperm.xlu0 %931, %v1265_v25  }
  0x34   :  { %106 = vmatpush.xpose.msra.mxu0 %v83_v26  ;;  %935 = vset.pattern.permute.xlu2 %v1155_v27 }
  0x35   :  { %907 = vmatpush.xpose.msra.mxu1 %v83_v26  ;;  %908 = vmatpush.xpose.msra.mxu2 %v83_v26 }
  0x36   :  { %909 = vmatpush.xpose.msra.mxu3 %v83_v26  ;;  %741 = vperm.xlu2 %935, %v1210_v8  }
  0x38   :  { %107 = vmatpush.xpose.msra.mxu0 %v82_v29 }
  0x39   :  { %910 = vmatpush.xpose.msra.mxu1 %v82_v29  ;;  %911 = vmatpush.xpose.msra.mxu2 %v82_v29 }
  0x3a   :  { %912 = vmatpush.xpose.msra.mxu3 %v82_v29 }
  0x3b   :  { %751 = vperm.xlu1 %934, %v1205_v6   ;;  %936 = vset.pattern.permute.xlu0 %v1155_v27 }
  0x3c   :  { %108 = vmatpush.xpose.msra.mxu0 %v81_v30  ;;  %746 = vperm.xlu0 %936, %v1193_v3  }
  0x3d   :  { %913 = vmatpush.xpose.msra.mxu1 %v81_v30  ;;  %914 = vmatpush.xpose.msra.mxu2 %v81_v30 }
  0x3e   :  { %915 = vmatpush.xpose.msra.mxu3 %v81_v30  ;;  %756 = vperm.xlu2 %935, %v1229_v14  }
  0x40   :  { %109 = vmatpush.xpose.msra.mxu0 %v80_v32 }
  0x41   :  { %916 = vmatpush.xpose.msra.mxu1 %v80_v32  ;;  %917 = vmatpush.xpose.msra.mxu2 %v80_v32 }
  0x42   :  { %918 = vmatpush.xpose.msra.mxu3 %v80_v32 }
  0x43   :  { %761 = vperm.xlu1 %934, %v165_v19  }
  0x44   :  { %110 = vmatpush.xpose.msra.mxu0 %v79_v33  ;;  %771 = vperm.xlu0 %936, %v1217_v10  }
  0x45   :  { %919 = vmatpush.xpose.msra.mxu1 %v79_v33  ;;  %920 = vmatpush.xpose.msra.mxu2 %v79_v33 }
  0x46   :  { %921 = vmatpush.xpose.msra.mxu3 %v79_v33  ;;  %766 = vperm.xlu2 %935, %v1222_v12  }
  0x47   :  { %111 = vmatmul.f32.vlgmr.msra.gmra.mxu0 %v63_v34 }
  0x48   :  { %123 = vmatmul.f32.vlgmr.msra.gmra.mxu1 %v67_v35  ;;  %135 = vmatmul.f32.vlgmr.msra.gmra.mxu2 %v71_v36 }
  0x49   :  { %147 = vmatmul.f32.vlgmr.msra.gmra.mxu3 %v75_v37 }
  0x4b   :  { %776 = vperm.xlu1 %934, %v168_v23  }
  0x4c   :  { %786 = vperm.xlu0 %936, %v1235_v15  }
  0x4e   :  { %781 = vperm.xlu2 %935, %v1240_v17  }
  0x4f   :  { %114 = vmatmul.f32.gmra.mxu0 %v64_v38 }
  0x50   :  { %126 = vmatmul.f32.gmra.mxu1 %v68_v39  ;;  %138 = vmatmul.f32.gmra.mxu2 %v72_v40 }
  0x51   :  { %150 = vmatmul.f32.gmra.mxu3 %v76_v41 }
  0x53   :  { %791 = vperm.xlu1 %934, %v171_v28  }
  0x54   :  { %801 = vperm.xlu0 %936, %v1250_v20  }
  0x56   :  { %796 = vperm.xlu2 %935, %v1255_v21  }
  0x57   :  { %117 = vmatmul.f32.gmra.mxu0 %v65_v42 }
  0x58   :  { %129 = vmatmul.f32.gmra.mxu1 %v69_v43  ;;  %141 = vmatmul.f32.gmra.mxu2 %v73_v44 }
  0x59   :  { %153 = vmatmul.f32.gmra.mxu3 %v77_v45 }
  0x5b   :  { %806 = vperm.xlu1 %934, %v174_v31  }
  0x5e   :  { %811 = vperm.xlu2 %935, %v1265_v25  }
  0x5f   :  { %120 = vmatmul.f32.gmra.mxu0 %v66_v46 }
  0x60   :  { %132 = vmatmul.f32.gmra.mxu1 %v70_v47  ;;  %144 = vmatmul.f32.gmra.mxu2 %v74_v48 }
  0x61   :  { %156 = vmatmul.f32.gmra.mxu3 %v78_v49 }
  0x65   :  { %v200_v52 = vpop.permute.xlu2 %199 }
  0x66   :  { %v262_v63 = vadd.f32 %v1337_v57, %v200_v52 }
  0x6d   :  { %v205_v55 = vpop.permute.xlu2 %204 }
  0x6e   :  { %v263_v18 = vadd.f32 %v1337_v57, %v205_v55 }
  0x75   :  { %v220_v60 = vpop.permute.xlu2 %219 }
  0x76   :  { %v266_v24 = vadd.f32 %v1337_v57, %v220_v60 }
  0x7c   :  { %v190_v51 = vpop.permute.xlu1 %189 }
  0x7d   :  { %v180_v50 = vpop.permute.xlu0 %179  ;;  %v235_v11 = vpop.permute.xlu2 %234  ;;  %v1351_v14 = vadd.f32 %v1337_v57, %v190_v51 }
  0x7e   :  { %v258_v58 = vadd.f32 %v1337_v57, %v180_v50  ;;  %v1371_v45 = vadd.f32 %v1337_v57, %v235_v11 }
  0x84   :  { %v195_v54 = vpop.permute.xlu1 %194 }
  0x85   :  { %v185_v53 = vpop.permute.xlu0 %184  ;;  %v1354_v17 = vadd.f32 %v1337_v57, %v195_v54  ;;  %v250_v50 = vpop.permute.xlu2 %249 }
  0x86   :  { %v259_v23 = vadd.f32 %v1337_v57, %v185_v53 }
  0x8c   :  { %v215_v59 = vpop.permute.xlu1 %214 }
  0x8d   :  { %v210_v56 = vpop.permute.xlu0 %209  ;;  %v1360_v27 = vadd.f32 %v1337_v57, %v215_v59 }
  0x8e   :  { %v1364_v31 = vadd.f32 %v1337_v57, %v210_v56 }
  0x94   :  { %v230_v10 = vpop.permute.xlu1 %229 }
  0x95   :  { %v225_v2 = vpop.permute.xlu0 %224  ;;  %v1374_v49 = vadd.f32 %v1337_v57, %v230_v10 }
  0x96   :  { %v1380_v53 = vadd.f32 %v1337_v57, %v225_v2 }
  0x9c   :  { %v245_v54 = vpop.permute.xlu1 %244 }
  0x9d   :  { %v240_v19 = vpop.permute.xlu0 %239  ;;  %v1386_v60 = vadd.f32 %v1337_v57, %v245_v54 }
  0x9e   :  { %v270_v38 = vadd.f32 %v1337_v57, %v240_v19 }
  0xc4   :  { %v112_v61 = vpop.f32.mrf.mxu0 }
  0xc5   :  { %v124_v62 = vpop.f32.mrf.mxu1  ;;  %v274_v0 = vmul.f32 2.0, %v112_v61  ;;  %v1389_v61 = vadd.f32 %v1337_v57, %v250_v50 }
  0xc6   :  { %v278_v1 = vmul.f32 2.0, %v124_v62  ;;  %v255_v62 = vpop.permute.xlu0 %254 }
  0xc7   :  { %v290_v3 = vsub.f32 %v258_v58, %v274_v0 }
  0xc8   :  { %v294_v4 = vsub.f32 %v262_v63, %v278_v1 }
  0xc9   :  { %v306_v7 = vmax.f32 %v290_v3, 0.0 }
  0xca   :  { %v310_v6 = vmax.f32 %v294_v4, 0.0 }
  0xcb   :  { %v136_v9 = vpop.f32.mrf.mxu2  ;;  %v1348_v12 = vmul.f32 %v1344_v5, %v306_v7 }
  0xcc   :  { %v328_v8 = vmul.f32 %v1344_v5, %v310_v6  ;;  %v115_v15 = vpop.f32.mrf.mxu0  ;;  %v282_v21 = vmul.f32 2.0, %v136_v9  ;;  %v148_v22 = vpop.f32.mrf.mxu3 }
  0xcd   :  { %v127_v16 = vpop.f32.mrf.mxu1  ;;  %v372_v28 = vmul.f32 0.5, %v1348_v12  ;;  %v275_v29 = vmul.f32 2.0, %v115_v15  ;;  %v340_v32 = vmul.f32 1.442695, %v1348_v12  ;;  %v436_v33 = vmul.f32 0.25, %v1348_v12 }
  0xce   :  { %v376_v13 = vmul.f32 0.5, %v328_v8  ;;  %v348_v25 = vmul.f32 1.442695, %v328_v8  ;;  %v440_v26 = vmul.f32 0.25, %v328_v8  ;;  %v279_v30 = vmul.f32 2.0, %v127_v16 }
  0xcf   :  { %v286_v34 = vmul.f32 2.0, %v148_v22  ;;  %v298_v35 = vsub.f32 %v266_v24, %v282_v21  ;;  %v291_v36 = vsub.f32 %v259_v23, %v275_v29  ;;  %v504_v40 = vmul.f32 0.125, %v328_v8 }
  0xd0   :  { %v396_v20 = vmul.f32 1.442695, %v376_v13  ;;  %v295_v37 = vsub.f32 %v263_v18, %v279_v30  ;;  %v460_v39 = vmul.f32 1.442695, %v440_v26  ;;  %v388_v41 = vmul.f32 1.442695, %v372_v28 }
  0xd1   :  { %v500_v42 = vmul.f32 0.125, %v1348_v12  ;;  %v307_v43 = vmax.f32 %v291_v36, 0.0  ;;  %v452_v46 = vmul.f32 1.442695, %v436_v33  ;;  %v568_v47 = vmul.f32 0.0625, %v328_v8 }
  0xd2   :  { %939 = vpow2.f32 %v396_v20  ;;  %v311_v44 = vmax.f32 %v295_v37, 0.0  ;;  %v302_v48 = vsub.f32 %v270_v38, %v286_v34  ;;  %v314_v51 = vmax.f32 %v298_v35, 0.0 }
  0xd3   :  { %941 = vpow2.f32 %v348_v25  ;;  %v524_v55 = vmul.f32 1.442695, %v504_v40  ;;  %v1383_v56 = vmul.f32 %v1344_v5, %v307_v43  ;;  %v139_v58 = vpop.f32.mrf.mxu2  ;;  %v516_v63 = vmul.f32 1.442695, %v500_v42 }
  0xd4   :  { %943 = vpow2.f32 %v340_v32  ;;  %v1377_v52 = vmul.f32 %v1344_v5, %v311_v44  ;;  %v588_v1 = vmul.f32 1.442695, %v568_v47  ;;  %v318_v2 = vmax.f32 %v302_v48, 0.0  ;;  %v118_v4 = vpop.f32.mrf.mxu0  ;;  %v151_v11 = vpop.f32.mrf.mxu3 }
  0xd5   :  { %945 = vpow2.f32 %v460_v39  ;;  %v130_v6 = vpop.f32.mrf.mxu1  ;;  %v1393_v8 = vmul.f32 %v1344_v5, %v314_v51  ;;  %v283_v10 = vmul.f32 2.0, %v139_v58  ;;  %v1397_v13 = vadd.f32 %v1337_v57, %v255_v62 }
  0xd6   :  { %947 = vpow2.f32 %v388_v41  ;;  %v377_v3 = vmul.f32 0.5, %v1377_v52  ;;  %v350_v9 = vmul.f32 1.442695, %v1377_v52  ;;  %v373_v15 = vmul.f32 0.5, %v1383_v56 }
  0xd7   :  { %949 = vpow2.f32 %v452_v46  ;;  %v441_v19 = vmul.f32 0.25, %v1377_v52  ;;  %v276_v20 = vmul.f32 2.0, %v118_v4  ;;  %v280_v21 = vmul.f32 2.0, %v130_v6 }
  0xd8   :  { %v940_v59 = vpop.eup %939  ;;  %951 = vpow2.f32 %v524_v55  ;;  %v398_v16 = vmul.f32 1.442695, %v377_v3  ;;  %v1404_v23 = vmul.f32 0.0625, %v1348_v12  ;;  %v1407_v24 = vmul.f32 %v1344_v5, %v318_v2 }
  0xd9   :  { %v942_v0 = vpop.eup %941  ;;  %953 = vpow2.f32 %v516_v63  ;;  %v287_v57 = vmul.f32 2.0, %v151_v11  ;;  %v356_v28 = vmul.f32 1.442695, %v1393_v8  ;;  %v299_v29 = vsub.f32 %v1380_v53, %v283_v10 }
  0xda   :  { %v424_v7 = vadd.f32 %v942_v0, %v940_v59  ;;  %v1400_v18 = vpop.eup %943  ;;  %955 = vpow2.f32 %v588_v1  ;;  %v380_v32 = vmul.f32 0.5, %v1393_v8  ;;  %v390_v33 = vmul.f32 1.442695, %v373_v15  ;;  %v1439_v0 = vpop.permute.xlu2 %741 }
  0xdb   :  { %v946_v22 = vpop.eup %945  ;;  %957 = vpow2.f32 %v350_v9  ;;  %v437_v12 = vmul.f32 0.25, %v1383_v56  ;;  %v462_v34 = vmul.f32 1.442695, %v441_v19  ;;  %v505_v35 = vmul.f32 0.125, %v1377_v52 }
  0xdc   :  { %v1409_v25 = vpop.eup %947  ;;  %v488_v26 = vadd.f32 %v946_v22, %v424_v7  ;;  %959 = vpow2.f32 %v398_v16  ;;  %v292_v36 = vsub.f32 %v1351_v14, %v276_v20  ;;  %v296_v37 = vsub.f32 %v1364_v31, %v280_v21 }
  0xdd   :  { %v1413_v30 = vpop.eup %949  ;;  %v1421_v39 = vmul.f32 1.442695, %v1407_v24  ;;  %v1424_v40 = vmul.f32 0.5, %v1407_v24  ;;  %v501_v41 = vmul.f32 0.125, %v1383_v56  ;;  %v303_v42 = vsub.f32 %v1386_v60, %v287_v57 }
  0xde   :  { %v952_v38 = vpop.eup %951  ;;  %v342_v46 = vmul.f32 1.442695, %v1383_v56  ;;  %v308_v47 = vmax.f32 %v292_v36, 0.0  ;;  %v312_v14 = vmax.f32 %v296_v37, 0.0  ;;  %961 = vpow2.f32 %v390_v33 }
  0xdf   :  { %v1428_v43 = vpop.eup %953  ;;  %v552_v44 = vadd.f32 %v952_v38, %v488_v26  ;;  %v454_v31 = vmul.f32 1.442695, %v437_v12  ;;  %v569_v50 = vmul.f32 0.0625, %v1377_v52  ;;  %v315_v51 = vmax.f32 %v299_v29, 0.0  ;;  %v1444_v52 = vld [vmem:[%s1611_s4 + $0x1] ss:$0 sm:$0xff] }
  0xe0   :  { %v956_v48 = vpop.eup %955  ;;  %963 = vpow2.f32 %v462_v34  ;;  %v526_v54 = vmul.f32 1.442695, %v505_v35  ;;  %v1433_v55 = vmul.f32 %v1344_v5, %v308_v47  ;;  %v1436_v58 = vmul.f32 %v1344_v5, %v312_v14  ;;  %s1156_s4 = smov [#allocation7]  }
  0xe1   :  { %v958_v53 = vpop.eup %957  ;;  %v518_v60 = vmul.f32 1.442695, %v501_v41  ;;  %v319_v62 = vmax.f32 %v303_v42, 0.0  ;;  %965 = vpow2.f32 %v356_v28  ;;  %v444_v63 = vmul.f32 0.25, %v1393_v8  ;;  %v1461_v28 = vpop.permute.xlu1 %736  ;;  %s862_s13 = sshll.u32 %s1156_s4, 4  ;;  %s863_s13 = int_to_ptr.vmem [resolvable:$true] %s862_s13 }
  0xe2   :  { %v960_v59 = vpop.eup %959  ;;  %v616_v1 = vadd.f32 %v956_v48, %v552_v44  ;;  %967 = vpow2.f32 %v342_v46  ;;  %v404_v2 = vmul.f32 1.442695, %v380_v32  ;;  %v508_v3 = vmul.f32 0.125, %v1393_v8 }
  0xe3   :  { %969 = vpow2.f32 %v454_v31  ;;  %v1448_v4 = vmul.f32 0.0625, %v1383_v56  ;;  %v425_v6 = vadd.f32 %v960_v59, %v958_v53  ;;  %v590_v7 = vmul.f32 1.442695, %v569_v50  ;;  %v121_v59 = vpop.f32.mrf.mxu0 }
  0xe4   :  { %971 = vpow2.f32 %v526_v54  ;;  %v1451_v9 = vmul.f32 %v1344_v5, %v315_v51  ;;  %v374_v10 = vmul.f32 0.5, %v1433_v55  ;;  %v352_v11 = vmul.f32 1.442695, %v1436_v58  ;;  %v962_v15 = vpop.eup %961  ;;  %v757_v51 = vpop.permute.xlu2 %756 }
  0xe5   :  { %973 = vpow2.f32 %v518_v60  ;;  %v1456_v16 = vmul.f32 %v1344_v5, %v319_v62  ;;  %v378_v19 = vmul.f32 0.5, %v1436_v58  ;;  %v468_v20 = vmul.f32 1.442695, %v444_v63 }
  0xe6   :  { %v964_v56 = vpop.eup %963  ;;  %v654_v21 = vmul.f32 %v1444_v52, %v616_v1  ;;  %v442_v22 = vmul.f32 0.25, %v1436_v58  ;;  %975 = vpow2.f32 %v404_v2  ;;  %v532_v57 = vmul.f32 1.442695, %v508_v3 }
  0xe7   :  { %v966_v26 = vpop.eup %965  ;;  %v489_v29 = vadd.f32 %v964_v56, %v425_v6  ;;  %977 = vpow2.f32 %v590_v7  ;;  %v344_v32 = vmul.f32 1.442695, %v1433_v55  ;;  %v506_v33 = vmul.f32 0.125, %v1436_v58 }
  0xe8   :  { %v968_v12 = vpop.eup %967  ;;  %979 = vpow2.f32 %v352_v11  ;;  %v392_v34 = vmul.f32 1.442695, %v374_v10  ;;  %v420_v35 = vadd.f32 %v1409_v25, %v1400_v18  ;;  %v438_v36 = vmul.f32 0.25, %v1433_v55 }
  0xe9   :  { %v970_v37 = vpop.eup %969  ;;  %v400_v38 = vmul.f32 1.442695, %v378_v19  ;;  %981 = vpow2.f32 %v468_v20  ;;  %v572_v41 = vmul.f32 0.0625, %v1393_v8  ;;  %v421_v42 = vadd.f32 %v968_v12, %v962_v15  ;;  %v142_v19 = vpop.f32.mrf.mxu2 }
  0xea   :  { %v972_v44 = vpop.eup %971  ;;  %v1470_v46 = vmul.f32 1.442695, %v1451_v9  ;;  %v381_v47 = vmul.f32 0.5, %v1451_v9  ;;  %v464_v14 = vmul.f32 1.442695, %v442_v22  ;;  %983 = vpow2.f32 %v532_v57 }
  0xeb   :  { %v974_v48 = vpop.eup %973  ;;  %v553_v31 = vadd.f32 %v972_v44, %v489_v29  ;;  %v1474_v18 = vmul.f32 1.442695, %v1456_v16  ;;  %v528_v25 = vmul.f32 1.442695, %v506_v33  ;;  %985 = vpow2.f32 %v344_v32  ;;  %v1491_v29 = vpop.permute.xlu1 %751 }
  0xec   :  { %v976_v50 = vpop.eup %975  ;;  %987 = vpow2.f32 %v392_v34  ;;  %v456_v8 = vmul.f32 1.442695, %v438_v36  ;;  %v484_v53 = vadd.f32 %v1413_v30, %v420_v35  ;;  %v502_v54 = vmul.f32 0.125, %v1433_v55  ;;  %v154_v30 = vpop.f32.mrf.mxu3 }
  0xed   :  { %v978_v60 = vpop.eup %977  ;;  %v1478_v62 = vmul.f32 %v757_v51, %v654_v21  ;;  %989 = vpow2.f32 %v400_v38  ;;  %v596_v63 = vmul.f32 1.442695, %v572_v41  ;;  %v485_v1 = vadd.f32 %v970_v37, %v421_v42 }
  0xee   :  { %v1480_v2 = vpop.eup %979  ;;  %991 = vpow2.f32 %v464_v14  ;;  %v1483_v3 = vmul.f32 0.0625, %v1436_v58  ;;  %v566_v6 = vmul.f32 0.0625, %v1433_v55  ;;  %v580_v7 = vmul.f32 1.442695, %v1404_v23 }
  0xef   :  { %v982_v10 = vpop.eup %981  ;;  %v617_v11 = vadd.f32 %v978_v60, %v553_v31  ;;  %993 = vpow2.f32 %v528_v25  ;;  %v428_v15 = vadd.f32 %v976_v50, %v966_v26  ;;  %v277_v20 = vmul.f32 2.0, %v121_v59  ;;  %v133_v26 = vpop.f32.mrf.mxu1 }
  0xf0   :  { %v1487_v56 = vpop.eup %983  ;;  %995 = vpow2.f32 %v456_v8  ;;  %v520_v21 = vmul.f32 1.442695, %v502_v54  ;;  %v548_v22 = vadd.f32 %v1428_v43, %v484_v53  ;;  %v582_v58 = vmul.f32 1.442695, %v1448_v4 }
  0xf1   :  { %v986_v57 = vpop.eup %985  ;;  %v549_v55 = vadd.f32 %v974_v48, %v485_v1  ;;  %v445_v23 = vmul.f32 0.25, %v1451_v9  ;;  %v288_v32 = vmul.f32 2.0, %v154_v30  ;;  %v293_v33 = vsub.f32 %v1354_v17, %v277_v20 }
  0xf2   :  { %v988_v12 = vpop.eup %987  ;;  %997 = vpow2.f32 %v596_v63  ;;  %v584_v34 = vmul.f32 1.442695, %v566_v6  ;;  %v509_v35 = vmul.f32 0.125, %v1451_v9  ;;  %v284_v36 = vmul.f32 2.0, %v142_v19 }
  0xf3   :  { %v990_v37 = vpop.eup %989  ;;  %v655_v43 = vmul.f32 %v1444_v52, %v617_v11  ;;  %v422_v4 = vadd.f32 %v988_v12, %v986_v57  ;;  %999 = vpow2.f32 %v580_v7  ;;  %v309_v38 = vmax.f32 %v293_v33, 0.0  ;;  %v762_v19 = vpop.permute.xlu1 %761 }
  0xf4   :  { %v1497_v41 = vpop.eup %991  ;;  %1001 = vpow2.f32 %v520_v21  ;;  %v406_v42 = vmul.f32 1.442695, %v381_v47  ;;  %v573_v44 = vmul.f32 0.0625, %v1451_v9  ;;  %v281_v17 = vmul.f32 2.0, %v133_v26 }
  0xf5   :  { %v1500_v14 = vpop.eup %993  ;;  %1003 = vpow2.f32 %v582_v58  ;;  %v470_v48 = vmul.f32 1.442695, %v445_v23  ;;  %v304_v31 = vsub.f32 %v1389_v61, %v288_v32  ;;  %v327_v25 = vmul.f32 %v1344_v5, %v309_v38 }
  0xf6   :  { %v996_v50 = vpop.eup %995  ;;  %v492_v51 = vadd.f32 %v982_v10, %v428_v15  ;;  %1005 = vpow2.f32 %v584_v34  ;;  %v534_v8 = vmul.f32 1.442695, %v509_v35  ;;  %v300_v53 = vsub.f32 %v1374_v49, %v284_v36 }
  0xf7   :  { %v486_v54 = vadd.f32 %v996_v50, %v422_v4  ;;  %1007 = vpow2.f32 %v1470_v46  ;;  %v346_v47 = vmul.f32 1.442695, %v327_v25  ;;  %v375_v9 = vmul.f32 0.5, %v327_v25 }
  0xf8   :  { %v1506_v59 = vpop.eup %997  ;;  %1009 = vpow2.f32 %v406_v42  ;;  %v439_v60 = vmul.f32 0.25, %v327_v25  ;;  %v503_v63 = vmul.f32 0.125, %v327_v25  ;;  %v297_v61 = vsub.f32 %v1360_v27, %v281_v17 }
  0xf9   :  { %v1000_v1 = vpop.eup %999  ;;  %1011 = vpow2.f32 %v470_v48  ;;  %v320_v6 = vmax.f32 %v304_v31, 0.0  ;;  %v394_v7 = vmul.f32 1.442695, %v375_v9  ;;  %v567_v30 = vmul.f32 0.0625, %v327_v25  ;;  %v157_v9 = vpop.f32.mrf.mxu3 }
  0xfa   :  { %v1002_v10 = vpop.eup %1001  ;;  %v612_v11 = vadd.f32 %v1000_v1, %v548_v22  ;;  %v598_v49 = vmul.f32 1.442695, %v573_v44  ;;  %1013 = vpow2.f32 %v346_v47  ;;  %v458_v15 = vmul.f32 1.442695, %v439_v60  ;;  %v145_v47 = vpop.f32.mrf.mxu2 }
  0xfb   :  { %v1004_v46 = vpop.eup %1003  ;;  %v550_v20 = vadd.f32 %v1002_v10, %v486_v54  ;;  %v316_v21 = vmax.f32 %v300_v53, 0.0  ;;  %1015 = vpow2.f32 %v394_v7  ;;  %v522_v58 = vmul.f32 1.442695, %v503_v63 }
  0xfc   :  { %v1006_v57 = vpop.eup %1005  ;;  %v1509_v23 = vmul.f32 %v762_v19, %v655_v43  ;;  %v613_v27 = vadd.f32 %v1004_v46, %v549_v55  ;;  %1017 = vpow2.f32 %v534_v8  ;;  %v313_v32 = vmax.f32 %v297_v61, 0.0 }
  0xfd   :  { %v1511_v33 = vpop.eup %1007  ;;  %v1514_v26 = vmul.f32 %v1344_v5, %v320_v6  ;;  %1019 = vpow2.f32 %v458_v15  ;;  %v586_v22 = vmul.f32 1.442695, %v567_v30  ;;  %v426_v12 = vadd.f32 %v990_v37, %v1480_v2 }
  0xfe   :  { %v1010_v34 = vpop.eup %1009  ;;  %v1518_v35 = vadd.f32 %v1487_v56, %v492_v51  ;;  %v650_v36 = vmul.f32 %v1444_v52, %v612_v11  ;;  %1021 = vpow2.f32 %v598_v49  ;;  %v331_v55 = vmul.f32 %v1344_v5, %v313_v32 }
  0xff   :  { %v1522_v43 = vpop.eup %1011  ;;  %v614_v4 = vadd.f32 %v1006_v57, %v550_v20  ;;  %v1525_v38 = vmul.f32 %v1344_v5, %v316_v21  ;;  %1023 = vpow2.f32 %v522_v58  ;;  %v592_v42 = vmul.f32 1.442695, %v1483_v3  ;;  %v747_v21 = vpop.permute.xlu0 %746 }
 0x100   :  { %v1014_v44 = vpop.eup %1013  ;;  %v651_v2 = vmul.f32 %v1444_v52, %v613_v27  ;;  %v354_v37 = vmul.f32 1.442695, %v331_v55  ;;  %v379_v56 = vmul.f32 0.5, %v331_v55  ;;  %v443_v17 = vmul.f32 0.25, %v331_v55 }
 0x101   :  { %v1016_v48 = vpop.eup %1015  ;;  %v1530_v31 = vmul.f32 1.442695, %v1514_v26  ;;  %v1533_v25 = vmul.f32 0.5, %v1514_v26  ;;  %1025 = vpow2.f32 %v586_v22  ;;  %v490_v50 = vadd.f32 %v1497_v41, %v426_v12 }
 0x102   :  { %v1536_v51 = vpop.eup %1017  ;;  %v814_v3 = vmul.f32 %v1461_v28, %v650_v36  ;;  %v402_v8 = vmul.f32 1.442695, %v379_v56  ;;  %v423_v53 = vadd.f32 %v1016_v48, %v1014_v44  ;;  %v507_v54 = vmul.f32 0.125, %v331_v55 }
 0x103   :  { %v1020_v60 = vpop.eup %1019  ;;  %v652_v63 = vmul.f32 %v1444_v52, %v614_v4  ;;  %1027 = vpow2.f32 %v354_v37  ;;  %v466_v61 = vmul.f32 1.442695, %v443_v17  ;;  %v571_v1 = vmul.f32 0.0625, %v331_v55 }
 0x104   :  { %v1540_v6 = vpop.eup %1021  ;;  %v815_v7 = vmul.f32 %v1439_v0, %v651_v2  ;;  %1029 = vpow2.f32 %v402_v8  ;;  %v487_v41 = vadd.f32 %v1020_v60, %v423_v53  ;;  %v448_v30 = vmul.f32 0.25, %v1407_v24 }
 0x105   :  { %v1024_v28 = vpop.eup %1023  ;;  %1031 = vpow2.f32 %v592_v42  ;;  %v412_v10 = vmul.f32 1.442695, %v1424_v40  ;;  %v285_v11 = vmul.f32 2.0, %v145_v47  ;;  %v289_v49 = vmul.f32 2.0, %v157_v9 }
 0x106   :  { %1033 = vpow2.f32 %v466_v61  ;;  %v530_v15 = vmul.f32 1.442695, %v507_v54  ;;  %v551_v46 = vadd.f32 %v1024_v28, %v487_v41  ;;  %v512_v19 = vmul.f32 0.125, %v1407_v24 }
 0x107   :  { %v1026_v20 = vpop.eup %1025  ;;  %v594_v58 = vmul.f32 1.442695, %v571_v1  ;;  %v576_v0 = vmul.f32 0.0625, %v1407_v24  ;;  %v301_v57 = vsub.f32 %v1371_v45, %v285_v11  ;;  %v305_v27 = vsub.f32 %v1397_v13, %v289_v49 }
 0x108   :  { %v816_v32 = vmul.f32 %v747_v21, %v652_v63  ;;  %v615_v22 = vadd.f32 %v1026_v20, %v551_v46  ;;  %1035 = vpow2.f32 %v1421_v39  ;;  %v476_v40 = vmul.f32 1.442695, %v448_v30 }
 0x109   :  { %v1028_v12 = vpop.eup %1027  ;;  %v830_v36 = vadd.f32 %v815_v7, %v814_v3  ;;  %v429_v55 = vadd.f32 %v1010_v34, %v1511_v33  ;;  %1037 = vpow2.f32 %v412_v10  ;;  %v317_v4 = vmax.f32 %v301_v57, 0.0 }
 0x10a   :  { %v1030_v42 = vpop.eup %1029  ;;  %1039 = vpow2.f32 %v530_v15  ;;  %v653_v44 = vmul.f32 %v1444_v52, %v615_v22  ;;  %v540_v24 = vmul.f32 1.442695, %v512_v19  ;;  %v321_v2 = vmax.f32 %v305_v27, 0.0 }
 0x10b   :  { %v1032_v45 = vpop.eup %1031  ;;  %v427_v37 = vadd.f32 %v1030_v42, %v1028_v12  ;;  %1041 = vpow2.f32 %v594_v58  ;;  %v604_v13 = vmul.f32 1.442695, %v576_v0  ;;  %v335_v56 = vmul.f32 %v1344_v5, %v317_v4  ;;  %v767_v12 = vpop.permute.xlu2 %766 }
 0x10c   :  { %v1034_v39 = vpop.eup %1033  ;;  %v831_v17 = vadd.f32 %v830_v36, %v816_v32  ;;  %v554_v48 = vadd.f32 %v1500_v14, %v490_v50  ;;  %v817_v33 = vmul.f32 %v1491_v29, %v653_v44  ;;  %1043 = vpow2.f32 %v476_v40 }
 0x10d   :  { %v491_v34 = vadd.f32 %v1034_v39, %v427_v37  ;;  %v362_v3 = vmul.f32 1.442695, %v335_v56  ;;  %v383_v8 = vmul.f32 0.5, %v335_v56  ;;  %v447_v53 = vmul.f32 0.25, %v335_v56 }
 0x10e   :  { %v1036_v54 = vpop.eup %1035  ;;  %1045 = vpow2.f32 %v540_v24  ;;  %v511_v47 = vmul.f32 0.125, %v335_v56  ;;  %v1556_v9 = vmul.f32 %v1344_v5, %v321_v2  ;;  %v416_v60 = vmul.f32 1.442695, %v1533_v25 }
 0x10f   :  { %v1038_v63 = vpop.eup %1037  ;;  %v832_v61 = vadd.f32 %v831_v17, %v817_v33  ;;  %1047 = vpow2.f32 %v604_v13  ;;  %v410_v1 = vmul.f32 1.442695, %v383_v8  ;;  %v450_v14 = vmul.f32 0.25, %v1514_v26 }
 0x110   :  { %v1040_v29 = vpop.eup %1039  ;;  %v620_v50 = vadd.f32 %v1506_v59, %v1518_v35  ;;  %v618_v7 = vadd.f32 %v1032_v45, %v554_v48  ;;  %1049 = vpow2.f32 %v362_v3  ;;  %v474_v41 = vmul.f32 1.442695, %v447_v53  ;;  %v772_v53 = vpop.permute.xlu0 %771 }
 0x111   :  { %v1042_v30 = vpop.eup %1041  ;;  %v382_v28 = vmul.f32 0.5, %v1525_v38  ;;  %v555_v5 = vadd.f32 %v1040_v29, %v491_v34  ;;  %1051 = vpow2.f32 %v410_v1  ;;  %v538_v10 = vmul.f32 1.442695, %v511_v47  ;;  %v777_v1 = vpop.permute.xlu1 %776 }
 0x112   :  { %v1563_v25 = vpop.eup %1043  ;;  %v493_v11 = vadd.f32 %v1522_v43, %v429_v55  ;;  %v370_v49 = vmul.f32 1.442695, %v1556_v9  ;;  %1053 = vpow2.f32 %v1530_v31  ;;  %v514_v15 = vmul.f32 0.125, %v1514_v26 }
 0x113   :  { %v360_v59 = vmul.f32 1.442695, %v1525_v38  ;;  %v833_v35 = vadd.f32 %v832_v61, %v1478_v62  ;;  %1055 = vpow2.f32 %v416_v60  ;;  %v480_v46 = vmul.f32 1.442695, %v450_v14 }
 0x114   :  { %v1571_v19 = vpop.eup %1045  ;;  %v656_v20 = vmul.f32 %v1444_v52, %v618_v7  ;;  %1057 = vpow2.f32 %v474_v41  ;;  %v575_v21 = vmul.f32 0.0625, %v335_v56  ;;  %v446_v43 = vmul.f32 0.25, %v1525_v38 }
 0x115   :  { %v1575_v58 = vpop.eup %1047  ;;  %v619_v0 = vadd.f32 %v1042_v30, %v555_v5  ;;  %1059 = vpow2.f32 %v538_v10  ;;  %v408_v31 = vmul.f32 1.442695, %v382_v28  ;;  %v510_v57 = vmul.f32 0.125, %v1525_v38 }
 0x116   :  { %v1050_v27 = vpop.eup %1049  ;;  %v557_v62 = vadd.f32 %v1536_v51, %v493_v11  ;;  %1061 = vpow2.f32 %v370_v49  ;;  %v387_v32 = vmul.f32 0.5, %v1556_v9  ;;  %v544_v22 = vmul.f32 1.442695, %v514_v15 }
 0x117   :  { %v1052_v40 = vpop.eup %1051  ;;  %v834_v36 = vadd.f32 %v833_v35, %v1509_v23  ;;  %1063 = vpow2.f32 %v480_v46  ;;  %v472_v55 = vmul.f32 1.442695, %v446_v43  ;;  %v574_v4 = vmul.f32 0.0625, %v1525_v38 }
 0x118   :  { %v1054_v42 = vpop.eup %1053  ;;  %v820_v44 = vmul.f32 %v767_v12, %v656_v20  ;;  %1065 = vpow2.f32 %v360_v59  ;;  %v431_v24 = vadd.f32 %v1052_v40, %v1050_v27  ;;  %v536_v2 = vmul.f32 1.442695, %v510_v57  ;;  %v782_v57 = vpop.permute.xlu2 %781 }
 0x119   :  { %v1056_v45 = vpop.eup %1055  ;;  %v657_v51 = vmul.f32 %v1444_v52, %v619_v0  ;;  %v602_v37 = vmul.f32 1.442695, %v575_v21  ;;  %1067 = vpow2.f32 %v408_v31  ;;  %v451_v13 = vmul.f32 0.25, %v1556_v9 }
 0x11a   :  { %v1058_v56 = vpop.eup %1057  ;;  %v658_v39 = vmul.f32 %v1444_v52, %v620_v50  ;;  %v432_v23 = vadd.f32 %v1038_v63, %v1036_v54  ;;  %v418_v17 = vmul.f32 1.442695, %v387_v32  ;;  %1069 = vpow2.f32 %v544_v22 }
 0x11b   :  { %v1060_v48 = vpop.eup %1059  ;;  %v385_v38 = vmul.f32 0.5, %v1456_v16  ;;  %v835_v33 = vadd.f32 %v834_v36, %v820_v44  ;;  %1071 = vpow2.f32 %v472_v55  ;;  %v600_v34 = vmul.f32 1.442695, %v574_v4 }
 0x11c   :  { %v1062_v3 = vpop.eup %1061  ;;  %v621_v8 = vadd.f32 %v1540_v6, %v557_v62  ;;  %v495_v47 = vadd.f32 %v1058_v56, %v431_v24  ;;  %1073 = vpow2.f32 %v536_v2  ;;  %v515_v60 = vmul.f32 0.125, %v1556_v9  ;;  %v787_v2 = vpop.permute.xlu0 %786 }
 0x11d   :  { %v1064_v61 = vpop.eup %1063  ;;  %v821_v14 = vmul.f32 %v772_v53, %v657_v51  ;;  %1075 = vpow2.f32 %v602_v37  ;;  %v482_v54 = vmul.f32 1.442695, %v451_v13  ;;  %v449_v63 = vmul.f32 0.25, %v1456_v16 }
 0x11e   :  { %v1066_v29 = vpop.eup %1065  ;;  %v822_v50 = vmul.f32 %v777_v1, %v658_v39  ;;  %v496_v7 = vadd.f32 %v1563_v25, %v432_v23  ;;  %v578_v41 = vmul.f32 0.0625, %v1514_v26  ;;  %1077 = vpow2.f32 %v418_v17 }
 0x11f   :  { %v1068_v6 = vpop.eup %1067  ;;  %v836_v30 = vadd.f32 %v835_v33, %v821_v14  ;;  %1079 = vpow2.f32 %v600_v34  ;;  %v414_v28 = vmul.f32 1.442695, %v385_v38  ;;  %v513_v5 = vmul.f32 0.125, %v1456_v16  ;;  %v792_v33 = vpop.permute.xlu1 %791 }
 0x120   :  { %v1070_v10 = vpop.eup %1069  ;;  %v430_v11 = vadd.f32 %v1068_v6, %v1066_v29  ;;  %v559_v49 = vadd.f32 %v1060_v48, %v495_v47  ;;  %v546_v15 = vmul.f32 1.442695, %v515_v60  ;;  %v579_v59 = vmul.f32 0.0625, %v1556_v9 }
 0x121   :  { %v1072_v35 = vpop.eup %1071  ;;  %v659_v46 = vmul.f32 %v1444_v52, %v621_v8  ;;  %1081 = vpow2.f32 %v482_v54  ;;  %v478_v25 = vmul.f32 1.442695, %v449_v63  ;;  %v577_v26 = vmul.f32 0.0625, %v1456_v16 }
 0x122   :  { %v1074_v20 = vpop.eup %1073  ;;  %v434_v21 = vadd.f32 %v1056_v45, %v1054_v42  ;;  %v608_v43 = vmul.f32 1.442695, %v578_v41  ;;  %v494_v0 = vadd.f32 %v1072_v35, %v430_v11  ;;  %1083 = vpow2.f32 %v1474_v18 }
 0x123   :  { %v1076_v31 = vpop.eup %1075  ;;  %v837_v27 = vadd.f32 %v836_v30, %v822_v50  ;;  %v560_v62 = vadd.f32 %v1571_v19, %v496_v7  ;;  %1085 = vpow2.f32 %v414_v28  ;;  %v542_v9 = vmul.f32 1.442695, %v513_v5 }
 0x124   :  { %v1078_v32 = vpop.eup %1077  ;;  %v558_v22 = vadd.f32 %v1074_v20, %v494_v0  ;;  %v623_v40 = vadd.f32 %v1076_v31, %v559_v49  ;;  %1087 = vpow2.f32 %v546_v15  ;;  %v610_v12 = vmul.f32 1.442695, %v579_v59  ;;  %v802_v6 = vpop.permute.xlu0 %801 }
 0x125   :  { %v1080_v36 = vpop.eup %1079  ;;  %v823_v16 = vmul.f32 %v782_v57, %v659_v46  ;;  %v435_v55 = vadd.f32 %v1078_v32, %v1062_v3  ;;  %1089 = vpow2.f32 %v478_v25  ;;  %v606_v4 = vmul.f32 1.442695, %v577_v26 }
 0x126   :  { %v498_v42 = vadd.f32 %v1064_v61, %v434_v21  ;;  %1091 = vpow2.f32 %v608_v43  ;;  %v622_v18 = vadd.f32 %v1080_v36, %v558_v22  ;;  %v624_v24 = vadd.f32 %v1575_v58, %v560_v62  ;;  %v797_v61 = vpop.permute.xlu2 %796 }
 0x127   :  { %v1082_v44 = vpop.eup %1081  ;;  %v838_v19 = vadd.f32 %v837_v27, %v823_v16  ;;  %1093 = vpow2.f32 %v542_v9  ;;  %v661_v37 = vmul.f32 %v1444_v52, %v623_v40  ;;  %v807_v49 = vpop.permute.xlu1 %806 }
 0x128   :  { %v1084_v45 = vpop.eup %1083  ;;  %v660_v51 = vmul.f32 %v1444_v52, %v622_v18  ;;  %v499_v13 = vadd.f32 %v1082_v44, %v435_v55  ;;  %1095 = vpow2.f32 %v610_v12  ;;  %v562_v23 = vadd.f32 %v1070_v10, %v498_v42 }
 0x129   :  { %v1086_v56 = vpop.eup %1085  ;;  %1097 = vpow2.f32 %v606_v4  ;;  %v662_v58 = vmul.f32 %v1444_v52, %v624_v24  ;;  %v825_v3 = vmul.f32 %v792_v33, %v661_v37 }
 0x12a   :  { %v1088_v39 = vpop.eup %1087  ;;  %v824_v17 = vmul.f32 %v787_v2, %v660_v51  ;;  %v433_v48 = vadd.f32 %v1086_v56, %v1084_v45 }
 0x12b   :  { %v1090_v38 = vpop.eup %1089  ;;  %v563_v53 = vadd.f32 %v1088_v39, %v499_v13  ;;  %v826_v50 = vmul.f32 %v797_v61, %v662_v58 }
 0x12c   :  { %v1092_v34 = vpop.eup %1091  ;;  %v839_v8 = vadd.f32 %v838_v19, %v824_v17  ;;  %v497_v47 = vadd.f32 %v1090_v38, %v433_v48 }
 0x12d   :  { %v1094_v60 = vpop.eup %1093  ;;  %v626_v14 = vadd.f32 %v1092_v34, %v562_v23 }
 0x12e   :  { %v1096_v1 = vpop.eup %1095  ;;  %v840_v54 = vadd.f32 %v839_v8, %v825_v3  ;;  %v561_v63 = vadd.f32 %v1094_v60, %v497_v47  ;;  %v812_v35 = vpop.permute.xlu2 %811 }
 0x12f   :  { %v1098_v29 = vpop.eup %1097  ;;  %v627_v7 = vadd.f32 %v1096_v1, %v563_v53  ;;  %v664_v30 = vmul.f32 %v1444_v52, %v626_v14 }
 0x130   :  { %v625_v41 = vadd.f32 %v1098_v29, %v561_v63  ;;  %v841_v5 = vadd.f32 %v840_v54, %v826_v50 }
 0x131   :  { %v665_v10 = vmul.f32 %v1444_v52, %v627_v7  ;;  %v828_v15 = vmul.f32 %v807_v49, %v664_v30 }
 0x132   :  { %v663_v28 = vmul.f32 %v1444_v52, %v625_v41 }
 0x133   :  { %v829_v46 = vmul.f32 %v812_v35, %v665_v10 }
 0x134   :  { %v827_v11 = vmul.f32 %v802_v6, %v663_v28 }
 0x136   :  { %v842_v59 = vadd.f32 %v841_v5, %v827_v11 }
 0x138   :  { %v843_v25 = vadd.f32 %v842_v59, %v828_v15 }
 0x13a   :  { %v844_v26 = vadd.f32 %v843_v25, %v829_v46 }
 0x13c   :  { %845 = vadd.xlane.f32.xlu0 %v844_v26 }
 0x1af   :  { %v846_v20 = vpop.xlane.xlu0 %845 }
 0x1b0   :  { %v847_v21 = vrot.slane %v846_v20, 4 }
 0x1b2   :  { %v848_v43 = vadd.f32 %v847_v21, %v846_v20 }
 0x1b4   :  { %v849_v0 = vrot.slane %v848_v43, 2 }
 0x1b6   :  { %v850_v31 = vadd.f32 %v849_v0, %v848_v43 }
 0x1b8   :  { %v851_v57 = vrot.slane %v850_v31, 1 }
 0x1ba   :  { %v852_v27 = vadd.f32 %v851_v57, %v850_v31 }
 0x1bc   :  { %922 = vpush %v852_v27 }
 0x1ed   :  { %s923_s17 = spop %922 }
 0x1ee   :  { %v854_v52 = vstv %s923_s17 }
 0x1ef   :  { %856 = vst [vmem:[#allocation7] sm:$0xff] %v854_v52 }
 0x1f0   :  { %867 = dma.vmem_to_hbm [thread:$0]  %s863_s13, 128, %s865_s16, [#allocation6]  }
 0x1f1   :  { %1149 = dma.done.wait [#allocation6], 128  }
 0x1f2   :  { %1150 = vsyncadd [#allocation6], 4294967168 }
 0x1f3   :  { %872 = vsyncpa [#allocation5], 1 }
 0x1f4   :  { %873 = vsyncpa [#allocation6], 1 }

</bundles_post_ra>
